<compile_context>
chip_gen: v6e
topology: v6e:2x2x1
jax: 0.10.0
libtpu: 0.0.40
codegen_flags: <defaults>
</compile_context>

<pallas_src>
import functools

import jax
import jax.numpy as jnp
from jax import lax
from jax.experimental import pallas as pl
from jax.experimental.pallas import tpu as pltpu


def _round_up(a, b):
    return (a + b - 1) // b * b


def _vmem_budget_bytes():
    """~80% of the per-core VMEM capacity (64 MiB fallback, v7x-safe)."""
    cap = 64 << 20
    try:
        info = pltpu.get_tpu_info()
        cap = int(getattr(info, "vmem_capacity_bytes", cap))
    except Exception:
        pass
    return int(cap * 0.8)


def _pairwise_mmd_kernel(
        ii_ref, jj_ref, ww_ref,                     # scalar prefetch (SMEM, int32)
        xi_ref, xj_ref, yi_ref, yj_ref,             # (tile, D) sample blocks
        sqxi_ref, sqxj_ref, sqyi_ref,               # (tile, 1) squared-norm columns
        rsqxj_ref, rsqyi_ref, rsqyj_ref,            # (1, tile) squared-norm rows
        out_ref, acc_ref, *,
        bandwidth_range, kernel, n_actual, tile, grid_n, per_chunk,
        needs_mask, approx_reciprocal, gram_dtype):
    c = pl.program_id(0)
    s = pl.program_id(1)
    p = c * per_chunk + s

    @pl.when(s == 0)
    def _():
        acc_ref[...] = jnp.zeros_like(acc_ref)

    w = ww_ref[p]

    @pl.when(w > 0)
    def _():
        i_blk = ii_ref[p]
        j_blk = jj_ref[p]

        xi = xi_ref[...]
        xj = xj_ref[...]
        yi = yi_ref[...]
        yj = yj_ref[...]
        if gram_dtype is not None:
            gxi, gxj = xi.astype(gram_dtype), xj.astype(gram_dtype)
            gyi, gyj = yi.astype(gram_dtype), yj.astype(gram_dtype)
        else:
            gxi, gxj, gyi, gyj = xi, xj, yi, yj

        # A @ B^T straight on the MXU: contract the feature dim of both
        # operands (no explicit transpose), f32 accumulation.
        dims = (((1,), (1,)), ((), ()))
        xx = lax.dot_general(gxi, gxj, dims, preferred_element_type=jnp.float32)
        yy = lax.dot_general(gyi, gyj, dims, preferred_element_type=jnp.float32)
        xy1 = lax.dot_general(gxi, gyj, dims, preferred_element_type=jnp.float32)
        xy2 = lax.dot_general(gxj, gyi, dims, preferred_element_type=jnp.float32)

        sqx_i = sqxi_ref[...]        # (tile, 1)
        sqx_j = sqxj_ref[...]        # (tile, 1)
        sqy_i = sqyi_ref[...]        # (tile, 1)
        rsqx_j = rsqxj_ref[...]      # (1, tile)
        rsqy_i = rsqyi_ref[...]      # (1, tile)
        rsqy_j = rsqyj_ref[...]      # (1, tile)

        dxx = sqx_i + rsqx_j - 2.0 * xx
        dyy = sqy_i + rsqy_j - 2.0 * yy
        dxy1 = sqx_i + rsqy_j - 2.0 * xy1
        dxy2 = sqx_j + rsqy_i - 2.0 * xy2
        if gram_dtype is not None:
            # Low-precision Gram worsens the ||a||^2 + ||b||^2 - 2ab
            # cancellation; clamp tiny negative distances at zero.
            dxx = jnp.maximum(dxx, 0.0)
            dyy = jnp.maximum(dyy, 0.0)
            dxy1 = jnp.maximum(dxy1, 0.0)
            dxy2 = jnp.maximum(dxy2, 0.0)

        def kern(dist):
            acc = jnp.zeros_like(dist)
            if kernel == "multiscale":
                for a in bandwidth_range:
                    a2 = jnp.float32(float(a) ** 2)
                    if approx_reciprocal:
                        acc = acc + a2 * pl.reciprocal(a2 + dist, approx=True)
                    else:
                        acc = acc + a2 / (a2 + dist)
            elif kernel == "rbf":
                for a in bandwidth_range:
                    # Fold -0.5 / a into one scalar (the torch reference
                    # divides by a, not a**2).
                    sc = jnp.float32(-0.5 / float(a))
                    acc = acc + jnp.exp(sc * dist)
            else:
                raise ValueError(f"unknown kernel {kernel!r}")
            return acc

        # tot1 is masked with (rows from block I, cols from block J),
        # tot2 with (rows from block J, cols from block I).
        tot1 = kern(dxx) + kern(dyy) - kern(dxy1)
        tot2 = kern(dxy2)
        w_f = w.astype(jnp.float32)

        if needs_mask:
            last = grid_n - 1
            boundary = (i_blk == last) | (j_blk == last)

            @pl.when(boundary)
            def _():
                ri = i_blk * tile + lax.broadcasted_iota(jnp.int32, (tile, tile), 0)
                cj = j_blk * tile + lax.broadcasted_iota(jnp.int32, (tile, tile), 1)
                rj = j_blk * tile + lax.broadcasted_iota(jnp.int32, (tile, tile), 0)
                ci = i_blk * tile + lax.broadcasted_iota(jnp.int32, (tile, tile), 1)
                m1 = (ri < n_actual) & (cj < n_actual)
                m2 = (rj < n_actual) & (ci < n_actual)
                t = jnp.where(m1, tot1, 0.0) - jnp.where(m2, tot2, 0.0)
                acc_ref[...] += w_f * jnp.sum(t, axis=0, keepdims=True)

            @pl.when(jnp.logical_not(boundary))
            def _():
                acc_ref[...] += w_f * jnp.sum(tot1 - tot2, axis=0, keepdims=True)
        else:
            acc_ref[...] += w_f * jnp.sum(tot1 - tot2, axis=0, keepdims=True)

    @pl.when(s == pl.num_programs(1) - 1)
    def _():
        out_ref[...] = acc_ref[...]


def _linear_mmd_kernel(x_ref, y_ref, out_ref, sx_ref, sy_ref, *, n_actual):
    i = pl.program_id(0)

    @pl.when(i == 0)
    def _():
        sx_ref[...] = jnp.zeros_like(sx_ref)
        sy_ref[...] = jnp.zeros_like(sy_ref)

    # Padded rows are zeros, so they contribute nothing to the column sums.
    sx_ref[...] += jnp.sum(x_ref[...].astype(jnp.float32), axis=0, keepdims=True)
    sy_ref[...] += jnp.sum(y_ref[...].astype(jnp.float32), axis=0, keepdims=True)

    @pl.when(i == pl.num_programs(0) - 1)
    def _():
        inv_n = jnp.float32(1.0 / n_actual)
        diff = (sx_ref[...] - sy_ref[...]) * inv_n
        out_ref[0, 0] = jnp.sum(diff * diff)


def mmd(x, y, bandwidth_range=(2.0,), kernel="multiscale", *,
        max_tile=None, approx_reciprocal=False, gram_dtype=None,
        interpret=False):
    """Pallas-TPU MMD. x, y: (N, D) float arrays with identical N and D."""
    assert x.ndim == 2 and y.ndim == 2, "x and y must be (N, D) matrices"
    assert x.shape[0] == y.shape[0], "x and y must have the same number of samples"
    assert x.shape[1] == y.shape[1], "x and y must have the same feature dimension"
    if kernel not in ("multiscale", "rbf", "linear"):
        raise ValueError(f"unknown kernel {kernel!r}")

    if x.dtype != y.dtype:
        cdt = jnp.promote_types(x.dtype, y.dtype)
        x = x.astype(cdt)
        y = y.astype(cdt)

    n, d = x.shape
    itemsize = jnp.dtype(x.dtype).itemsize
    sublane = max(8, 32 // itemsize)                 # 8 f32, 16 bf16, 32 int8

    budget = _vmem_budget_bytes()
    if max_tile is None:
        # 128 MiB VMEM parts (v5e/v6e) -> 512; 64 MiB parts (v7x) -> 256.
        max_tile = 512 if budget >= (96 << 20) else 256
    max_tile = max(int(max_tile), sublane)

    n_bw = 0 if kernel == "linear" else max(1, len(bandwidth_range))

    def _work_bytes(t):
        if kernel == "linear":
            return 2 * 2 * t * d * itemsize + 4 * d * 4 + (1 << 20)
        inputs = 4 * 2 * t * d * itemsize            # double-buffered sample blocks
        norms = 6 * 2 * (t + 1) * 4                  # double-buffered norm slabs
        temps = (12 + 4 * n_bw) * t * t * 4          # Gram/dist/kernel/mask temporaries
        return inputs + norms + temps + 4 * t * 4 + (1 << 20)

    # Tile selection: biggest tile that fits the VMEM budget; multi-tile runs
    # use lane-aligned (multiple of 128) tiles so the (1, N) norm slabs tile.
    full = _round_up(n, sublane)
    tile = min(full, _round_up(max_tile, sublane))
    if tile < full:
        tile = max(128, (tile // 128) * 128)
    while _work_bytes(tile) > budget and tile > 128:
        tile = max(128, ((tile - 1) // 128) * 128)

    n_pad = _round_up(n, tile)
    grid_n = n_pad // tile
    if n_pad != n:
        x = jnp.pad(x, ((0, n_pad - n), (0, 0)))
        y = jnp.pad(y, ((0, n_pad - n), (0, 0)))

    if kernel == "linear":
        # linear MMD == ||mean(x, 0) - mean(y, 0)||^2 : O(N*D), no Gram tiles.
        body = functools.partial(_linear_mmd_kernel, n_actual=n)
        out = pl.pallas_call(
            body,
            out_shape=jax.ShapeDtypeStruct((1, 1), jnp.float32),
            grid_spec=pltpu.PrefetchScalarGridSpec(
                num_scalar_prefetch=0,
                grid=(grid_n,),
                in_specs=[
                    pl.BlockSpec((tile, d), lambda i: (i, 0)),
                    pl.BlockSpec((tile, d), lambda i: (i, 0)),
                ],
                out_specs=pl.BlockSpec((1, 1), lambda i: (0, 0)),
                scratch_shapes=[
                    pltpu.VMEM((1, d), jnp.float32),
                    pltpu.VMEM((1, d), jnp.float32),
                ],
            ),
            compiler_params=pltpu.CompilerParams(
                dimension_semantics=("arbitrary",),
                vmem_limit_bytes=int(budget)),
            interpret=interpret,
        )(x, y)
        return out[0, 0]

    # ---- squared row norms, precomputed once (O(N*D)), both orientations ----
    xf = x.astype(jnp.float32)
    yf = y.astype(jnp.float32)
    sqx = jnp.sum(xf * xf, axis=1)
    sqy = jnp.sum(yf * yf, axis=1)
    sqx_col = sqx[:, None]        # (n_pad, 1)
    sqy_col = sqy[:, None]        # (n_pad, 1)
    sqx_row = sqx[None, :]        # (1, n_pad)
    sqy_row = sqy[None, :]        # (1, n_pad)

    # ---- upper-triangle pair tables (scalar prefetch) ----
    pairs = [(a, b) for a in range(grid_n) for b in range(a, grid_n)]
    n_pairs = len(pairs)
    if n_pairs >= 64:
        n_chunks = 8
    elif n_pairs >= 12:
        n_chunks = 4
    elif n_pairs >= 2:
        n_chunks = 2
    else:
        n_chunks = 1
    per_chunk = -(-n_pairs // n_chunks)

    flat_i, flat_j, flat_w = [], [], []
    for k in range(n_chunks * per_chunk):
        if k < n_pairs:
            a, b = pairs[k]
            w = 1 if a == b else 2
        else:
            # Padding pair: repeat the previous indices (no new DMA), weight 0.
            a, b, w = flat_i[-1], flat_j[-1], 0
        flat_i.append(a)
        flat_j.append(b)
        flat_w.append(w)
    ii = jnp.array(flat_i, dtype=jnp.int32)
    jj = jnp.array(flat_j, dtype=jnp.int32)
    ww = jnp.array(flat_w, dtype=jnp.int32)

    PER = per_chunk

    def _im_i(c, s, ii_r, jj_r, ww_r):
        return (ii_r[c * PER + s], 0)

    def _im_j(c, s, ii_r, jj_r, ww_r):
        return (jj_r[c * PER + s], 0)

    def _im_row_i(c, s, ii_r, jj_r, ww_r):
        return (0, ii_r[c * PER + s])

    def _im_row_j(c, s, ii_r, jj_r, ww_r):
        return (0, jj_r[c * PER + s])

    def _im_out(c, s, ii_r, jj_r, ww_r):
        return (0, c)

    body = functools.partial(
        _pairwise_mmd_kernel,
        bandwidth_range=tuple(float(a) for a in bandwidth_range),
        kernel=kernel,
        n_actual=n,
        tile=tile,
        grid_n=grid_n,
        per_chunk=per_chunk,
        needs_mask=(n_pad != n),
        approx_reciprocal=bool(approx_reciprocal),
        gram_dtype=gram_dtype,
    )

    partials = pl.pallas_call(
        body,
        out_shape=jax.ShapeDtypeStruct((1, n_chunks * tile), jnp.float32),
        grid_spec=pltpu.PrefetchScalarGridSpec(
            num_scalar_prefetch=3,
            grid=(n_chunks, per_chunk),
            in_specs=[
                pl.BlockSpec((tile, d), _im_i),      # x rows, block I
                pl.BlockSpec((tile, d), _im_j),      # x rows, block J
                pl.BlockSpec((tile, d), _im_i),      # y rows, block I
                pl.BlockSpec((tile, d), _im_j),      # y rows, block J
                pl.BlockSpec((tile, 1), _im_i),      # ||x||^2 column, block I
                pl.BlockSpec((tile, 1), _im_j),      # ||x||^2 column, block J
                pl.BlockSpec((tile, 1), _im_i),      # ||y||^2 column, block I
                pl.BlockSpec((1, tile), _im_row_j),  # ||x||^2 row, block J
                pl.BlockSpec((1, tile), _im_row_i),  # ||y||^2 row, block I
                pl.BlockSpec((1, tile), _im_row_j),  # ||y||^2 row, block J
            ],
            out_specs=pl.BlockSpec((1, tile), _im_out),
            scratch_shapes=[pltpu.VMEM((1, tile), jnp.float32)],
        ),
        compiler_params=pltpu.CompilerParams(
            dimension_semantics=("parallel", "arbitrary"),
            vmem_limit_bytes=int(budget),
        ),
        interpret=interpret,
    )(ii, jj, ww, x, x, y, y,
      sqx_col, sqx_col, sqy_col, sqx_row, sqy_row, sqy_row)

    # Tiny epilogue in plain JAX: lane reduce of the per-chunk slabs and the
    # fused-mean normalization by N^2.
    return jnp.sum(partials) / jnp.float32(n * n)


def _mmd_reference(x, y, bandwidth_range=(2.0,), kernel="multiscale"):
    x = x.astype(jnp.float32)
    y = y.astype(jnp.float32)
    xx, yy, zz = x @ x.T, y @ y.T, x @ y.T
    rx = jnp.broadcast_to(jnp.diag(xx)[None, :], xx.shape)
    ry = jnp.broadcast_to(jnp.diag(yy)[None, :], yy.shape)
    dxx = rx.T + rx - 2.0 * xx
    dyy = ry.T + ry - 2.0 * yy
    dxy = rx.T + ry - 2.0 * zz
    XX = jnp.zeros_like(xx)
    YY = jnp.zeros_like(xx)
    XY = jnp.zeros_like(xx)
    if kernel == "multiscale":
        for a in bandwidth_range:
            XX += a**2 * (a**2 + dxx) ** (-1)
            YY += a**2 * (a**2 + dyy) ** (-1)
            XY += a**2 * (a**2 + dxy) ** (-1)
    elif kernel == "rbf":
        for a in bandwidth_range:
            XX += jnp.exp(-0.5 * dxx / a)
            YY += jnp.exp(-0.5 * dyy / a)
            XY += jnp.exp(-0.5 * dxy / a)
    elif kernel == "linear":
        XX += xx
        YY += yy
        XY += zz
    return jnp.mean(XX + YY - 2.0 * XY)


if __name__ == "__main__":
    key = jax.random.PRNGKey(0)
    kx, ky, kx2, ky2 = jax.random.split(key, 4)

    # Small shapes consistent with the module: two sample matrices (N, D).
    N, D = 8, 32
    x = jax.random.normal(kx, (N, D), dtype=jnp.float32)
    y = 0.5 * jax.random.normal(ky, (N, D), dtype=jnp.float32) + 0.3

    # multiscale (exact reciprocal is now the default) -> tight tolerance.
    ref = _mmd_reference(x, y, bandwidth_range=(2.0,), kernel="multiscale")
    out = jax.block_until_ready(
        mmd(x, y, bandwidth_range=(2.0,), kernel="multiscale"))
    assert jnp.allclose(out, ref, atol=1e-5, rtol=1e-5), (out, ref)

    # multiscale with the opt-in EUP approximate reciprocal (loose tolerance
    # only because of the approximation).
    out_a = jax.block_until_ready(
        mmd(x, y, bandwidth_range=(2.0,), kernel="multiscale",
            approx_reciprocal=True))
    assert jnp.allclose(out_a, ref, atol=1e-2, rtol=1e-2), (out_a, ref)

    # rbf with several bandwidths.
    bws = (0.5, 1.0, 2.0)
    out_r = jax.block_until_ready(mmd(x, y, bandwidth_range=bws, kernel="rbf"))
    ref_r = _mmd_reference(x, y, bandwidth_range=bws, kernel="rbf")
    assert jnp.allclose(out_r, ref_r, atol=1e-4, rtol=1e-4), (out_r, ref_r)

    # linear (O(N*D) fast path).
    out_l = jax.block_until_ready(mmd(x, y, kernel="linear"))
    ref_l = _mmd_reference(x, y, kernel="linear")
    assert jnp.allclose(out_l, ref_l, atol=1e-4, rtol=1e-4), (out_l, ref_l)

    # Tiled + masked + symmetric (upper-triangle) path: N not a multiple of the
    # tile, several blocks, boundary-gated mask, diagonal/off-diagonal/padding
    # pairs all exercised.
    N2, D2 = 200, 64
    x2 = jax.random.normal(kx2, (N2, D2), dtype=jnp.float32)
    y2 = 0.5 * jax.random.normal(ky2, (N2, D2), dtype=jnp.float32) + 0.3
    out_t = jax.block_until_ready(
        mmd(x2, y2, bandwidth_range=(1.0, 2.0), kernel="multiscale",
            max_tile=128))
    ref_t = _mmd_reference(x2, y2, bandwidth_range=(1.0, 2.0), kernel="multiscale")
    assert jnp.allclose(out_t, ref_t, atol=1e-3, rtol=1e-3), (out_t, ref_t)

    out_tr = jax.block_until_ready(
        mmd(x2, y2, bandwidth_range=(2.0,), kernel="rbf", max_tile=128))
    ref_tr = _mmd_reference(x2, y2, bandwidth_range=(2.0,), kernel="rbf")
    assert jnp.allclose(out_tr, ref_tr, atol=1e-3, rtol=1e-3), (out_tr, ref_tr)

    # Opt-in bf16 Gram feed for f32 inputs (MXU fast path): smoke test.
    out_b = jax.block_until_ready(
        mmd(x2, y2, bandwidth_range=(2.0,), kernel="multiscale",
            max_tile=128, gram_dtype=jnp.bfloat16))
    assert bool(jnp.isfinite(out_b)), out_b

    print("KERNEL_OK")
</pallas_src>

<mosaic_0001>
module attributes {stable_mosaic.version = 11 : i64} {
  func.func @_pairwise_mmd_kernel(%arg0: i32, %arg1: i32, %arg2: memref<1xi32, #tpu.memory_space<smem>>, %arg3: memref<1xi32, #tpu.memory_space<smem>>, %arg4: memref<1xi32, #tpu.memory_space<smem>>, %arg5: memref<8x32xf32, #tpu.memory_space<vmem>>, %arg6: memref<8x32xf32, #tpu.memory_space<vmem>>, %arg7: memref<8x32xf32, #tpu.memory_space<vmem>>, %arg8: memref<8x32xf32, #tpu.memory_space<vmem>>, %arg9: memref<8x1xf32, #tpu.memory_space<vmem>>, %arg10: memref<8x1xf32, #tpu.memory_space<vmem>>, %arg11: memref<8x1xf32, #tpu.memory_space<vmem>>, %arg12: memref<1x8xf32, #tpu.memory_space<vmem>>, %arg13: memref<1x8xf32, #tpu.memory_space<vmem>>, %arg14: memref<1x8xf32, #tpu.memory_space<vmem>>, %arg15: memref<1x8xf32, #tpu.memory_space<vmem>>, %arg16: memref<1x8xf32, #tpu.memory_space<vmem>>) attributes {dimension_semantics = [#tpu.dimension_semantics<parallel>, #tpu.dimension_semantics<arbitrary>], iteration_bounds = array<i64: 1, 1>, scalar_prefetch = 3 : i64, scratch_operands = 1 : i64, tpu.core_type = #tpu.core_type<tc>, window_params = [{transform_indices = @transform_0, window_bounds = array<i64: 8, 32>}, {transform_indices = @transform_1, window_bounds = array<i64: 8, 32>}, {transform_indices = @transform_2, window_bounds = array<i64: 8, 32>}, {transform_indices = @transform_3, window_bounds = array<i64: 8, 32>}, {transform_indices = @transform_4, window_bounds = array<i64: 8, 1>}, {transform_indices = @transform_5, window_bounds = array<i64: 8, 1>}, {transform_indices = @transform_6, window_bounds = array<i64: 8, 1>}, {transform_indices = @transform_7, window_bounds = array<i64: 1, 8>}, {transform_indices = @transform_8, window_bounds = array<i64: 1, 8>}, {transform_indices = @transform_9, window_bounds = array<i64: 1, 8>}, {transform_indices = @transform_10, window_bounds = array<i64: 1, 8>}]} {
    %c1_i32 = arith.constant 1 : i32
    %0 = arith.muli %arg0, %c1_i32 : i32
    %1 = arith.addi %0, %arg1 : i32
    %c0_i32 = arith.constant 0 : i32
    %2 = arith.cmpi eq, %arg1, %c0_i32 : i32
    %3 = arith.extui %2 : i1 to i32
    %c0_i32_0 = arith.constant 0 : i32
    %4 = arith.cmpi ne, %3, %c0_i32_0 : i32
    scf.if %4 {
      %cst = arith.constant 0.000000e+00 : f32
      %13 = vector.broadcast %cst : f32 to vector<1x8xf32>
      %c0 = arith.constant 0 : index
      %c0_5 = arith.constant 0 : index
      %14 = vector.load %arg16[%c0, %c0_5] : memref<1x8xf32, #tpu.memory_space<vmem>>, vector<1x8xf32>
      tpu.vector_store %arg16[%c0, %c0_5], %13 {strides = array<i32>} : memref<1x8xf32, #tpu.memory_space<vmem>>, vector<1x8xf32>,
    } else {
    }
    %5 = arith.index_cast %1 : i32 to index
    %6 = memref.load %arg4[%5] : memref<1xi32, #tpu.memory_space<smem>>
    %c0_i32_1 = arith.constant 0 : i32
    %7 = arith.cmpi sgt, %6, %c0_i32_1 : i32
    %8 = arith.extui %7 : i1 to i32
    %c0_i32_2 = arith.constant 0 : i32
    %9 = arith.cmpi ne, %8, %c0_i32_2 : i32
    scf.if %9 {
      %c0 = arith.constant 0 : index
      %c0_5 = arith.constant 0 : index
      %13 = vector.load %arg5[%c0, %c0_5] : memref<8x32xf32, #tpu.memory_space<vmem>>, vector<8x32xf32>
      %c0_6 = arith.constant 0 : index
      %c0_7 = arith.constant 0 : index
      %14 = vector.load %arg6[%c0_6, %c0_7] : memref<8x32xf32, #tpu.memory_space<vmem>>, vector<8x32xf32>
      %c0_8 = arith.constant 0 : index
      %c0_9 = arith.constant 0 : index
      %15 = vector.load %arg7[%c0_8, %c0_9] : memref<8x32xf32, #tpu.memory_space<vmem>>, vector<8x32xf32>
      %c0_10 = arith.constant 0 : index
      %c0_11 = arith.constant 0 : index
      %16 = vector.load %arg8[%c0_10, %c0_11] : memref<8x32xf32, #tpu.memory_space<vmem>>, vector<8x32xf32>
      %cst = arith.constant dense<0.000000e+00> : vector<8x8xf32>
      %17 = tpu.matmul %13, %14, %cst {dimension_numbers = #tpu.dot_dimension_numbers<[1], [1], [0], [0], [0, 0, 1, 0], [], []>} : vector<8x32xf32>, vector<8x32xf32>, vector<8x8xf32> -> vector<8x8xf32>
      %cst_12 = arith.constant dense<0.000000e+00> : vector<8x8xf32>
      %18 = tpu.matmul %15, %16, %cst_12 {dimension_numbers = #tpu.dot_dimension_numbers<[1], [1], [0], [0], [0, 0, 1, 0], [], []>} : vector<8x32xf32>, vector<8x32xf32>, vector<8x8xf32> -> vector<8x8xf32>
      %cst_13 = arith.constant dense<0.000000e+00> : vector<8x8xf32>
      %19 = tpu.matmul %13, %16, %cst_13 {dimension_numbers = #tpu.dot_dimension_numbers<[1], [1], [0], [0], [0, 0, 1, 0], [], []>} : vector<8x32xf32>, vector<8x32xf32>, vector<8x8xf32> -> vector<8x8xf32>
      %cst_14 = arith.constant dense<0.000000e+00> : vector<8x8xf32>
      %20 = tpu.matmul %14, %15, %cst_14 {dimension_numbers = #tpu.dot_dimension_numbers<[1], [1], [0], [0], [0, 0, 1, 0], [], []>} : vector<8x32xf32>, vector<8x32xf32>, vector<8x8xf32> -> vector<8x8xf32>
      %c0_15 = arith.constant 0 : index
      %c0_16 = arith.constant 0 : index
      %21 = vector.load %arg9[%c0_15, %c0_16] : memref<8x1xf32, #tpu.memory_space<vmem>>, vector<8x1xf32>
      %c0_17 = arith.constant 0 : index
      %c0_18 = arith.constant 0 : index
      %22 = vector.load %arg10[%c0_17, %c0_18] : memref<8x1xf32, #tpu.memory_space<vmem>>, vector<8x1xf32>
      %c0_19 = arith.constant 0 : index
      %c0_20 = arith.constant 0 : index
      %23 = vector.load %arg11[%c0_19, %c0_20] : memref<8x1xf32, #tpu.memory_space<vmem>>, vector<8x1xf32>
      %c0_21 = arith.constant 0 : index
      %c0_22 = arith.constant 0 : index
      %24 = vector.load %arg12[%c0_21, %c0_22] : memref<1x8xf32, #tpu.memory_space<vmem>>, vector<1x8xf32>
      %c0_23 = arith.constant 0 : index
      %c0_24 = arith.constant 0 : index
      %25 = vector.load %arg13[%c0_23, %c0_24] : memref<1x8xf32, #tpu.memory_space<vmem>>, vector<1x8xf32>
      %c0_25 = arith.constant 0 : index
      %c0_26 = arith.constant 0 : index
      %26 = vector.load %arg14[%c0_25, %c0_26] : memref<1x8xf32, #tpu.memory_space<vmem>>, vector<1x8xf32>
      %27 = vector.broadcast %21 : vector<8x1xf32> to vector<8x8xf32>
      %28 = vector.broadcast %24 : vector<1x8xf32> to vector<8x8xf32>
      %29 = arith.addf %27, %28 : vector<8x8xf32>
      %cst_27 = arith.constant 2.000000e+00 : f32
      %30 = vector.broadcast %cst_27 : f32 to vector<8x8xf32>
      %31 = arith.mulf %30, %17 : vector<8x8xf32>
      %32 = arith.subf %29, %31 : vector<8x8xf32>
      %33 = vector.broadcast %23 : vector<8x1xf32> to vector<8x8xf32>
      %34 = vector.broadcast %26 : vector<1x8xf32> to vector<8x8xf32>
      %35 = arith.addf %33, %34 : vector<8x8xf32>
      %cst_28 = arith.constant 2.000000e+00 : f32
      %36 = vector.broadcast %cst_28 : f32 to vector<8x8xf32>
      %37 = arith.mulf %36, %18 : vector<8x8xf32>
      %38 = arith.subf %35, %37 : vector<8x8xf32>
      %39 = vector.broadcast %21 : vector<8x1xf32> to vector<8x8xf32>
      %40 = vector.broadcast %26 : vector<1x8xf32> to vector<8x8xf32>
      %41 = arith.addf %39, %40 : vector<8x8xf32>
      %cst_29 = arith.constant 2.000000e+00 : f32
      %42 = vector.broadcast %cst_29 : f32 to vector<8x8xf32>
      %43 = arith.mulf %42, %19 : vector<8x8xf32>
      %44 = arith.subf %41, %43 : vector<8x8xf32>
      %45 = vector.broadcast %22 : vector<8x1xf32> to vector<8x8xf32>
      %46 = vector.broadcast %25 : vector<1x8xf32> to vector<8x8xf32>
      %47 = arith.addf %45, %46 : vector<8x8xf32>
      %cst_30 = arith.constant 2.000000e+00 : f32
      %48 = vector.broadcast %cst_30 : f32 to vector<8x8xf32>
      %49 = arith.mulf %48, %20 : vector<8x8xf32>
      %50 = arith.subf %47, %49 : vector<8x8xf32>
      %cst_31 = arith.constant 0.000000e+00 : f32
      %51 = vector.broadcast %cst_31 : f32 to vector<8x8xf32>
      %cst_32 = arith.constant 4.000000e+00 : f32
      %52 = vector.broadcast %cst_32 : f32 to vector<8x8xf32>
      %53 = arith.addf %52, %32 : vector<8x8xf32>
      %cst_33 = arith.constant 4.000000e+00 : f32
      %54 = vector.broadcast %cst_33 : f32 to vector<8x8xf32>
      %55 = arith.divf %54, %53 : vector<8x8xf32>
      %56 = arith.addf %51, %55 : vector<8x8xf32>
      %cst_34 = arith.constant 0.000000e+00 : f32
      %57 = vector.broadcast %cst_34 : f32 to vector<8x8xf32>
      %cst_35 = arith.constant 4.000000e+00 : f32
      %58 = vector.broadcast %cst_35 : f32 to vector<8x8xf32>
      %59 = arith.addf %58, %38 : vector<8x8xf32>
      %cst_36 = arith.constant 4.000000e+00 : f32
      %60 = vector.broadcast %cst_36 : f32 to vector<8x8xf32>
      %61 = arith.divf %60, %59 : vector<8x8xf32>
      %62 = arith.addf %57, %61 : vector<8x8xf32>
      %63 = arith.addf %56, %62 : vector<8x8xf32>
      %cst_37 = arith.constant 0.000000e+00 : f32
      %64 = vector.broadcast %cst_37 : f32 to vector<8x8xf32>
      %cst_38 = arith.constant 4.000000e+00 : f32
      %65 = vector.broadcast %cst_38 : f32 to vector<8x8xf32>
      %66 = arith.addf %65, %44 : vector<8x8xf32>
      %cst_39 = arith.constant 4.000000e+00 : f32
      %67 = vector.broadcast %cst_39 : f32 to vector<8x8xf32>
      %68 = arith.divf %67, %66 : vector<8x8xf32>
      %69 = arith.addf %64, %68 : vector<8x8xf32>
      %70 = arith.subf %63, %69 : vector<8x8xf32>
      %cst_40 = arith.constant 0.000000e+00 : f32
      %71 = vector.broadcast %cst_40 : f32 to vector<8x8xf32>
      %cst_41 = arith.constant 4.000000e+00 : f32
      %72 = vector.broadcast %cst_41 : f32 to vector<8x8xf32>
      %73 = arith.addf %72, %50 : vector<8x8xf32>
      %cst_42 = arith.constant 4.000000e+00 : f32
      %74 = vector.broadcast %cst_42 : f32 to vector<8x8xf32>
      %75 = arith.divf %74, %73 : vector<8x8xf32>
      %76 = arith.addf %71, %75 : vector<8x8xf32>
      %77 = arith.sitofp %6 : i32 to f32
      %c0_43 = arith.constant 0 : index
      %c0_44 = arith.constant 0 : index
      %78 = vector.load %arg16[%c0_43, %c0_44] : memref<1x8xf32, #tpu.memory_space<vmem>>, vector<1x8xf32>
      %79 = arith.subf %70, %76 : vector<8x8xf32>
      %cst_45 = arith.constant dense<0.000000e+00> : vector<8xf32>
      %80 = vector.multi_reduction <add>, %79, %cst_45 [0] : vector<8x8xf32> to vector<8xf32>
      %81 = vector.shape_cast %80 : vector<8xf32> to vector<1x8xf32>
      %82 = vector.broadcast %77 : f32 to vector<1x8xf32>
      %83 = arith.mulf %82, %81 : vector<1x8xf32>
      %84 = arith.addf %78, %83 : vector<1x8xf32>
      %c0_46 = arith.constant 0 : index
      %c0_47 = arith.constant 0 : index
      %85 = vector.load %arg16[%c0_46, %c0_47] : memref<1x8xf32, #tpu.memory_space<vmem>>, vector<1x8xf32>
      tpu.vector_store %arg16[%c0_46, %c0_47], %84 {strides = array<i32>} : memref<1x8xf32, #tpu.memory_space<vmem>>, vector<1x8xf32>,
    } else {
    }
    %c0_i32_3 = arith.constant 0 : i32
    %10 = arith.cmpi eq, %arg1, %c0_i32_3 : i32
    %11 = arith.extui %10 : i1 to i32
    %c0_i32_4 = arith.constant 0 : i32
    %12 = arith.cmpi ne, %11, %c0_i32_4 : i32
    scf.if %12 {
      %c0 = arith.constant 0 : index
      %c0_5 = arith.constant 0 : index
      %13 = vector.load %arg16[%c0, %c0_5] : memref<1x8xf32, #tpu.memory_space<vmem>>, vector<1x8xf32>
      %c0_6 = arith.constant 0 : index
      %c0_7 = arith.constant 0 : index
      %14 = vector.load %arg15[%c0_6, %c0_7] : memref<1x8xf32, #tpu.memory_space<vmem>>, vector<1x8xf32>
      tpu.vector_store %arg15[%c0_6, %c0_7], %13 {strides = array<i32>} : memref<1x8xf32, #tpu.memory_space<vmem>>, vector<1x8xf32>,
    } else {
    }
    return
  }
  func.func @transform_0(%arg0: i32, %arg1: i32, %arg2: memref<1xi32, #tpu.memory_space<smem>>, %arg3: memref<1xi32, #tpu.memory_space<smem>>, %arg4: memref<1xi32, #tpu.memory_space<smem>>) -> (i32, i32) {
    %c1_i32 = arith.constant 1 : i32
    %0 = arith.muli %arg0, %c1_i32 : i32
    %1 = arith.addi %0, %arg1 : i32
    %2 = arith.index_cast %1 : i32 to index
    %3 = memref.load %arg2[%2] : memref<1xi32, #tpu.memory_space<smem>>
    %c0_i32 = arith.constant 0 : i32
    %c0_i32_0 = arith.constant 0 : i32
    return %3, %c0_i32 : i32, i32
  }
  func.func @transform_1(%arg0: i32, %arg1: i32, %arg2: memref<1xi32, #tpu.memory_space<smem>>, %arg3: memref<1xi32, #tpu.memory_space<smem>>, %arg4: memref<1xi32, #tpu.memory_space<smem>>) -> (i32, i32) {
    %c1_i32 = arith.constant 1 : i32
    %0 = arith.muli %arg0, %c1_i32 : i32
    %1 = arith.addi %0, %arg1 : i32
    %2 = arith.index_cast %1 : i32 to index
    %3 = memref.load %arg3[%2] : memref<1xi32, #tpu.memory_space<smem>>
    %c0_i32 = arith.constant 0 : i32
    %c0_i32_0 = arith.constant 0 : i32
    return %3, %c0_i32 : i32, i32
  }
  func.func @transform_2(%arg0: i32, %arg1: i32, %arg2: memref<1xi32, #tpu.memory_space<smem>>, %arg3: memref<1xi32, #tpu.memory_space<smem>>, %arg4: memref<1xi32, #tpu.memory_space<smem>>) -> (i32, i32) {
    %c1_i32 = arith.constant 1 : i32
    %0 = arith.muli %arg0, %c1_i32 : i32
    %1 = arith.addi %0, %arg1 : i32
    %2 = arith.index_cast %1 : i32 to index
    %3 = memref.load %arg2[%2] : memref<1xi32, #tpu.memory_space<smem>>
    %c0_i32 = arith.constant 0 : i32
    %c0_i32_0 = arith.constant 0 : i32
    return %3, %c0_i32 : i32, i32
  }
  func.func @transform_3(%arg0: i32, %arg1: i32, %arg2: memref<1xi32, #tpu.memory_space<smem>>, %arg3: memref<1xi32, #tpu.memory_space<smem>>, %arg4: memref<1xi32, #tpu.memory_space<smem>>) -> (i32, i32) {
    %c1_i32 = arith.constant 1 : i32
    %0 = arith.muli %arg0, %c1_i32 : i32
    %1 = arith.addi %0, %arg1 : i32
    %2 = arith.index_cast %1 : i32 to index
    %3 = memref.load %arg3[%2] : memref<1xi32, #tpu.memory_space<smem>>
    %c0_i32 = arith.constant 0 : i32
    %c0_i32_0 = arith.constant 0 : i32
    return %3, %c0_i32 : i32, i32
  }
  func.func @transform_4(%arg0: i32, %arg1: i32, %arg2: memref<1xi32, #tpu.memory_space<smem>>, %arg3: memref<1xi32, #tpu.memory_space<smem>>, %arg4: memref<1xi32, #tpu.memory_space<smem>>) -> (i32, i32) {
    %c1_i32 = arith.constant 1 : i32
    %0 = arith.muli %arg0, %c1_i32 : i32
    %1 = arith.addi %0, %arg1 : i32
    %2 = arith.index_cast %1 : i32 to index
    %3 = memref.load %arg2[%2] : memref<1xi32, #tpu.memory_space<smem>>
    %c0_i32 = arith.constant 0 : i32
    %c0_i32_0 = arith.constant 0 : i32
    return %3, %c0_i32 : i32, i32
  }
  func.func @transform_5(%arg0: i32, %arg1: i32, %arg2: memref<1xi32, #tpu.memory_space<smem>>, %arg3: memref<1xi32, #tpu.memory_space<smem>>, %arg4: memref<1xi32, #tpu.memory_space<smem>>) -> (i32, i32) {
    %c1_i32 = arith.constant 1 : i32
    %0 = arith.muli %arg0, %c1_i32 : i32
    %1 = arith.addi %0, %arg1 : i32
    %2 = arith.index_cast %1 : i32 to index
    %3 = memref.load %arg3[%2] : memref<1xi32, #tpu.memory_space<smem>>
    %c0_i32 = arith.constant 0 : i32
    %c0_i32_0 = arith.constant 0 : i32
    return %3, %c0_i32 : i32, i32
  }
  func.func @transform_6(%arg0: i32, %arg1: i32, %arg2: memref<1xi32, #tpu.memory_space<smem>>, %arg3: memref<1xi32, #tpu.memory_space<smem>>, %arg4: memref<1xi32, #tpu.memory_space<smem>>) -> (i32, i32) {
    %c1_i32 = arith.constant 1 : i32
    %0 = arith.muli %arg0, %c1_i32 : i32
    %1 = arith.addi %0, %arg1 : i32
    %2 = arith.index_cast %1 : i32 to index
    %3 = memref.load %arg2[%2] : memref<1xi32, #tpu.memory_space<smem>>
    %c0_i32 = arith.constant 0 : i32
    %c0_i32_0 = arith.constant 0 : i32
    return %3, %c0_i32 : i32, i32
  }
  func.func @transform_7(%arg0: i32, %arg1: i32, %arg2: memref<1xi32, #tpu.memory_space<smem>>, %arg3: memref<1xi32, #tpu.memory_space<smem>>, %arg4: memref<1xi32, #tpu.memory_space<smem>>) -> (i32, i32) {
    %c1_i32 = arith.constant 1 : i32
    %0 = arith.muli %arg0, %c1_i32 : i32
    %1 = arith.addi %0, %arg1 : i32
    %2 = arith.index_cast %1 : i32 to index
    %3 = memref.load %arg3[%2] : memref<1xi32, #tpu.memory_space<smem>>
    %c0_i32 = arith.constant 0 : i32
    %c0_i32_0 = arith.constant 0 : i32
    return %c0_i32, %3 : i32, i32
  }
  func.func @transform_8(%arg0: i32, %arg1: i32, %arg2: memref<1xi32, #tpu.memory_space<smem>>, %arg3: memref<1xi32, #tpu.memory_space<smem>>, %arg4: memref<1xi32, #tpu.memory_space<smem>>) -> (i32, i32) {
    %c1_i32 = arith.constant 1 : i32
    %0 = arith.muli %arg0, %c1_i32 : i32
    %1 = arith.addi %0, %arg1 : i32
    %2 = arith.index_cast %1 : i32 to index
    %3 = memref.load %arg2[%2] : memref<1xi32, #tpu.memory_space<smem>>
    %c0_i32 = arith.constant 0 : i32
    %c0_i32_0 = arith.constant 0 : i32
    return %c0_i32, %3 : i32, i32
  }
  func.func @transform_9(%arg0: i32, %arg1: i32, %arg2: memref<1xi32, #tpu.memory_space<smem>>, %arg3: memref<1xi32, #tpu.memory_space<smem>>, %arg4: memref<1xi32, #tpu.memory_space<smem>>) -> (i32, i32) {
    %c1_i32 = arith.constant 1 : i32
    %0 = arith.muli %arg0, %c1_i32 : i32
    %1 = arith.addi %0, %arg1 : i32
    %2 = arith.index_cast %1 : i32 to index
    %3 = memref.load %arg3[%2] : memref<1xi32, #tpu.memory_space<smem>>
    %c0_i32 = arith.constant 0 : i32
    %c0_i32_0 = arith.constant 0 : i32
    return %c0_i32, %3 : i32, i32
  }
  func.func @transform_10(%arg0: i32, %arg1: i32, %arg2: memref<1xi32, #tpu.memory_space<smem>>, %arg3: memref<1xi32, #tpu.memory_space<smem>>, %arg4: memref<1xi32, #tpu.memory_space<smem>>) -> (i32, i32) {
    %c0_i32 = arith.constant 0 : i32
    %c0_i32_0 = arith.constant 0 : i32
    return %c0_i32, %arg0 : i32, i32
  }
}

</mosaic_0001>

<bundles_post_ra>
// kernel: tpu_custom_call.1
= control target key start
LH: loop header
LB: loop body
LE: loop exit
PB: predicated region body
PF: predicated region fallthrough
CT: control target
= control target key end

     0   :  { %s979_s0 = inlined_call_operand.<no memory space> [shape: s32[1], index: 0, kind: input, shape index: {}]   ;;  %s980_s1 = inlined_call_operand.<no memory space> [shape: s32[1], index: 1, kind: input, shape index: {}]   ;;  %s981_s2 = inlined_call_operand.<no memory space> [shape: s32[1], index: 2, kind: input, shape index: {}]   ;;  %s982_s3 = inlined_call_operand.vmem [shape: f32[8,32], index: 3, kind: input, shape index: {}]   ;;  %s983_s4 = inlined_call_operand.vmem [shape: f32[8,32], index: 4, kind: input, shape index: {}]   ;;  %s984_s5 = inlined_call_operand.vmem [shape: f32[8,32], index: 5, kind: input, shape index: {}]   ;;  %s985_s6 = inlined_call_operand.vmem [shape: f32[8,32], index: 6, kind: input, shape index: {}]   ;;  %s986_s7 = inlined_call_operand.vmem [shape: f32[8,1], index: 7, kind: input, shape index: {}]   ;;  %s987_s8 = inlined_call_operand.vmem [shape: f32[8,1], index: 8, kind: input, shape index: {}]   ;;  %s988_s9 = inlined_call_operand.vmem [shape: f32[8,1], index: 9, kind: input, shape index: {}]   ;;  %s989_s10 = inlined_call_operand.vmem [shape: f32[1,8], index: 10, kind: input, shape index: {}]   ;;  %s990_s11 = inlined_call_operand.vmem [shape: f32[1,8], index: 11, kind: input, shape index: {}]   ;;  %s991_s12 = inlined_call_operand.vmem [shape: f32[1,8], index: 12, kind: input, shape index: {}]   ;;  %s992_s13 = inlined_call_operand.hbm [shape: f32[1,8], index: 13, kind: output, shape index: {}]  }
   0x1   :  { %994 = sst [smem:[#allocation10_spill]] %s990_s11 }
   0x2   :  { %995 = sst [smem:[#allocation11_spill]] %s992_s13 }
   0x3   :  { %21 = vsyncpa [#allocation8], 0  ;;  %p178_p0 = scmp.lt.s32.totalorder %s979_s0, 0  ;;  %p186_p1 = scmp.lt.s32.totalorder %s980_s1, 0  ;;  %vm258_vm0 = vcmask 57344   ;;  %v802_v0 = vmov 0.0  }
   0x4   :  { %259 = vst.msk [vmem:[#allocation2] sm:$0x1] %vm258_vm0, %v802_v0  ;;  %p725_p2 = scmp.le.s32.totalorder %s981_s2, 0 }
   0x5   :  { %s1000_s0 = smov (!%p178_p0, %s979_s0), 0  ;;  %s1002_s1 = smov (!%p186_p1, %s980_s1), 0 }
   0x6   :  { %s895_s16 = sshll.u32 %s1000_s0, 3  ;;  %s906_s23 = sshll.u32 %s1002_s1, 3 }
   0x7   :  { %s181_s22 = scalar_lea.vmem %s982_s3, %s895_s16  ;;  %s189_s26 = scalar_lea.vmem %s983_s4, %s906_s23 }
   0x8   :  { %s197_s29 = scalar_lea.vmem %s984_s5, %s895_s16  ;;  %s205_s15 = scalar_lea.vmem %s985_s6, %s906_s23 }
   0x9   :  { %s213_s3 = scalar_lea.vmem %s986_s7, %s895_s16  ;;  %s221_s19 = scalar_lea.vmem %s987_s8, %s906_s23 }
   0xa   :  { %s229_s4 = scalar_lea.vmem %s988_s9, %s895_s16  ;;  %s236_s5 = scalar_lea.vmem %s989_s10, %s1002_s1 }
   0xb   :  { %s250_s6 = scalar_lea.vmem %s991_s12, %s1002_s1  ;;  %264 = sbr.rel (%p725_p2) target bundleno = 262 (0x106), region = 49 }
   0xc   :  { %s996_s9 = sld [smem:[#allocation10_spill]] (!%p725_p2)  ;;  %s631_s10 = scvt.s32.f32 (!%p725_p2), %s981_s2 }
  0x10   :  { %v266_v1 = vld [vmem:[%s189_s26] sm:$0xff]  ;;  %vm269_vm1 = vcmask 261120   ;;  %v803_v3 = vmov 0.0   ;;  %vm804_vm2 = vmmov 0   ;;  %v805_v8 = vmov 0  }
  0x11   :  { %v268_v2 = vld [vmem:[%s205_s15] sm:$0xff]  ;;  %745 = vmatprep.subr.mxu0 %v803_v3  ;;  %750 = vmatprep.subr.mxu1 %v803_v3  ;;  %vm634_vm3 = vcmask 64512   ;;  %v642_v57 = vstv %s631_s10 }
  0x12   :  { %746 = vmatpush3.xpose.msk.msra.mxu0 %vm269_vm1, %v266_v1  ;;  %751 = vmatpush3.xpose.msk.msra.mxu1 %vm269_vm1, %v268_v2  ;;  %v265_v4 = vld [vmem:[%s181_s22] sm:$0xff]  ;;  %s997_s16 = scalar_lea.vmem %s996_s9, %s1000_s0 }
  0x13   :  { %v267_v5 = vld [vmem:[%s197_s29] sm:$0xff]  ;;  %747 = vmatprep.mubr.msk.f32.mxu0 %vm804_vm2, %v803_v3  ;;  %752 = vmatprep.mubr.msk.f32.mxu1 %vm804_vm2, %v803_v3 }
  0x14   :  { %755 = vmatprep.subr.mxu0 %v803_v3  ;;  %760 = vmatprep.subr.mxu1 %v803_v3  ;;  %v562_v6 = vld [vmem:[%s213_s3] sm:$0xff] }
  0x15   :  { %748 = vmatmul.mubr.msk.f32.vlgmr.msra.gmra.mxu0 %vm269_vm1, %v265_v4  ;;  %753 = vmatmul.mubr.msk.f32.vlgmr.msra.gmra.mxu1 %vm269_vm1, %v267_v5  ;;  %v563_v7 = vld [vmem:[%s221_s19] sm:$0xff] }
  0x16   :  { %756 = vmatpush3.xpose.msk.msra.mxu0 %vm269_vm1, %v268_v2  ;;  %761 = vmatpush3.xpose.msk.msra.mxu1 %vm269_vm1, %v267_v5  ;;  %v564_v9 = vld [vmem:[%s229_s4] sm:$0xff] }
  0x17   :  { %757 = vmatprep.mubr.msk.f32.mxu0 %vm804_vm2, %v803_v3  ;;  %762 = vmatprep.mubr.msk.f32.mxu1 %vm804_vm2, %v803_v3  ;;  %v734_v11 = vld [vmem:[%s236_s5] ss:$0 sm:$0xff] }
  0x18   :  { %770 = vset.pattern.permute.xlu0 %v805_v8  ;;  %771 = vset.pattern.permute.xlu1 %v805_v8  ;;  %v735_v12 = vld [vmem:[%s250_s6] ss:$0 sm:$0xff] }
  0x19   :  { %758 = vmatmul.mubr.msk.f32.vlgmr.msra.gmra.mxu0 %vm269_vm1, %v265_v4  ;;  %763 = vmatmul.mubr.msk.f32.vlgmr.msra.gmra.mxu1 %vm269_vm1, %v266_v1  ;;  %v736_v17 = vld [vmem:[%s997_s16] ss:$0 sm:$0xff] }
  0x1a   :  { %570 = vperm.xlu0 %770, %v562_v6   ;;  %601 = vperm.xlu1 %771, %v563_v7   ;;  %v632_v59 = vld [vmem:[#allocation2] sm:$0x1] }
  0x1e   :  { %584 = vperm.xlu0 %770, %v564_v9  }
  0x95   :  { %v571_v10 = vpop.permute.xlu0 %570  ;;  %v602_v14 = vpop.permute.xlu1 %601 }
  0x96   :  { %v579_v18 = vadd.f32 %v734_v11, %v571_v10  ;;  %v610_v26 = vadd.f32 %v736_v17, %v602_v14  ;;  %v596_v27 = vadd.f32 %v735_v12, %v571_v10 }
  0x99   :  { %v585_v13 = vpop.permute.xlu0 %584 }
  0x9a   :  { %v593_v19 = vadd.f32 %v735_v12, %v585_v13 }
  0xd5   :  { %v342_v15 = vpop.f32.mrf.mxu0  ;;  %v418_v16 = vpop.f32.mrf.mxu1 }
  0xd6   :  { %v580_v20 = vmul.f32 2.0, %v342_v15  ;;  %v594_v21 = vmul.f32 2.0, %v418_v16 }
  0xd7   :  { %v749_v22 = vpop.f32.mrf.mxu0  ;;  %v754_v23 = vpop.f32.mrf.mxu1 }
  0xd8   :  { %v581_v24 = vsub.f32 %v579_v18, %v580_v20  ;;  %v595_v25 = vsub.f32 %v593_v19, %v594_v21 }
  0xd9   :  { %v488_v28 = vpop.f32.mrf.mxu0  ;;  %v558_v29 = vpop.f32.mrf.mxu1 }
  0xda   :  { %v613_v30 = vadd.f32 4.0, %v581_v24  ;;  %v617_v31 = vadd.f32 4.0, %v595_v25  ;;  %v597_v32 = vmul.f32 2.0, %v488_v28  ;;  %v611_v33 = vmul.f32 2.0, %v558_v29 }
  0xdb   :  { %v759_v34 = vpop.f32.mrf.mxu0  ;;  %v764_v35 = vpop.f32.mrf.mxu1 }
  0xdc   :  { %772 = vrcp.f32 %v613_v30  ;;  %v598_v36 = vsub.f32 %v596_v27, %v597_v32  ;;  %v612_v37 = vsub.f32 %v610_v26, %v611_v33 }
  0xdd   :  { %774 = vrcp.f32 %v617_v31 }
  0xde   :  { %v622_v38 = vadd.f32 4.0, %v598_v36  ;;  %v627_v39 = vadd.f32 4.0, %v612_v37 }
  0xe0   :  { %776 = vrcp.f32 %v622_v38 }
  0xe1   :  { %778 = vrcp.f32 %v627_v39 }
  0xe9   :  { %v773_v40 = vpop.eup %772 }
  0xea   :  { %v775_v41 = vpop.eup %774  ;;  %v615_v42 = vmul.f32 4.0, %v773_v40 }
  0xeb   :  { %v619_v43 = vmul.f32 4.0, %v775_v41 }
  0xed   :  { %v777_v44 = vpop.eup %776  ;;  %v621_v46 = vadd.f32 %v619_v43, %v615_v42 }
  0xee   :  { %v779_v45 = vpop.eup %778  ;;  %v624_v47 = vmul.f32 4.0, %v777_v44 }
  0xef   :  { %v629_v48 = vmul.f32 4.0, %v779_v45 }
  0xf0   :  { %v626_v49 = vsub.f32 %v621_v46, %v624_v47 }
  0xf2   :  { %v633_v50 = vsub.f32 %v626_v49, %v629_v48 }
  0xf4   :  { %v635_v51 = vsel %vm634_vm3, %v633_v50, 0.0 }
  0xf5   :  { %v636_v52 = vrot.slane %v635_v51, 4 }
  0xf7   :  { %v637_v53 = vadd.f32 %v636_v52, %v635_v51 }
  0xf9   :  { %v638_v54 = vrot.slane %v637_v53, 2 }
  0xfb   :  { %v639_v55 = vadd.f32 %v638_v54, %v637_v53 }
  0xfd   :  { %v640_v56 = vrot.slane %v639_v55, 1 }
  0xff   :  { %v641_v58 = vadd.f32 %v640_v56, %v639_v55 }
 0x101   :  { %v643_v60 = vmul.f32 %v642_v57, %v641_v58 }
 0x103   :  { %v644_v61 = vadd.f32 %v643_v60, %v632_v59 }
 0x105   :  { %646 = vst.msk [vmem:[#allocation2] sm:$0x1] %vm258_vm0, %v644_v61 }
 0x106 PF:  { %s806_s12 = smov [#allocation7]  }
 0x107   :  { %s659_s29 = sshll.u32 %s806_s12, 4  ;;  %s660_s29 = int_to_ptr.vmem [resolvable:$true] %s659_s29 }
 0x108   :  { %s780_s15 = scalar_lea.vmem %s660_s29, 16  ;;  %s784_s17 = scalar_lea.vmem %s660_s29, 32 }
 0x109   :  { %p781_p3 = scmp.ne.s32.totalorder %s660_s29, %s780_s15  ;;  %p785_p4 = scmp.lt.s32.totalorder %s660_s29, %s660_s29 }
 0x10a   :  { %p786_p5 = scmp.lt.s32.totalorder %s784_s17, %s780_s15 }
 0x10c   :  { %v650_v62 = vld [vmem:[#allocation2] sm:$0x1]  ;;  %p787_p6 = por %p786_p5, %p785_p4 }
 0x10d   :  { %652 = vst.msk [vmem:[#allocation7] sm:$0x1] %vm258_vm0, %v650_v62 }
 0x10e   :  { %p788_p7 = pnand %p787_p6, %p781_p3 }
 0x110   :  { %791 = shalt.err (!%p788_p7)
}
 0x111   :  { %s998_s3 = sld [smem:[#allocation11_spill]] }
 0x117   :  { %662 = dma.vmem_to_hbm [thread:$0]  %s660_s29, 16, %s998_s3, [#allocation8]  }
 0x118   :  { %800 = dma.done.wait [#allocation8], 16  }
 0x119   :  { %801 = vsyncadd [#allocation8], 4294967280 }
 0x11a   :  { %666 = vsyncpa [#allocation8], 1 }

</bundles_post_ra>
